<compile_context>
chip_gen: v5e
topology: v5e:2x2
jax: 0.10.0
libtpu: 0.0.40
codegen_flags: <defaults>
</compile_context>

<pallas_src>
import jax
import jax.numpy as jnp
from jax.experimental import pallas as pl
from jax.experimental.pallas import tpu as pltpu

ROWS, COLS = 8, 256   # room-grid slab: sublane x lane aligned, lane-dense


# ----------------------------------------------------------------------------
# Module-init preprocessing (done once, outside the forward).
# ----------------------------------------------------------------------------
def init_forcing(inputs, constants):
    """Fold the 5 constants into a single precomputed forcing term F[t].

    inputs:    (T_a, S_t, E_h, O), each (T, ROWS, COLS) f32
    constants: (a_a, a_s, a_h, a_v, a_o) python floats
    Returns (forcing, a_av) with forcing (T, ROWS, COLS) f32, a_av (1,) f32.
    """
    T_a, S_t, E_h, O = inputs
    a_a, a_s, a_h, a_v, a_o = constants
    a_av = a_a + a_v
    forcing = (a_av * T_a + a_s * S_t + a_h * E_h + a_o * O).astype(jnp.float32)
    return forcing, jnp.asarray([a_av], dtype=jnp.float32)


# ----------------------------------------------------------------------------
# Kernels
# ----------------------------------------------------------------------------
def _ode_step_kernel(idx_ref, a_av_ref, T_r_ref, f_ref, out_ref):
    # idx_ref:  SMEM scalar prefetch (1,) int32 -- consumed by the index_map
    # a_av_ref: SMEM (1,) f32
    # f_ref:    VMEM (ROWS, COLS) -- F[idx], selected in-pipeline
    del idx_ref
    out_ref[...] = f_ref[...] - a_av_ref[0] * T_r_ref[...]


def _ode_fused_kernel(a_av_ref, T_r_ref, f_ref, out_ref):
    # f_ref/out_ref: VMEM (TB, ROWS, COLS); T_r_ref: VMEM (ROWS, COLS)
    out_ref[...] = f_ref[...] - (a_av_ref[0] * T_r_ref[...])[None, :, :]


# ----------------------------------------------------------------------------
# Wrappers
# ----------------------------------------------------------------------------
def room_temperature_ode(t_idx, a_av, T_r, forcing):
    """Single derivative evaluation (matches RoomTemperatureODE.forward).

    t_idx:   int32 (1,)             -- time index (scalar prefetch)
    a_av:    f32   (1,)             -- a_a + a_v (folded at init)
    T_r:     f32   (ROWS, COLS)     -- room state
    forcing: f32   (T, ROWS, COLS)  -- precomputed F[t] (folded at init)
    Returns dT/dt with shape (ROWS, COLS).
    """
    T = forcing.shape[0]
    rows, cols = T_r.shape

    # Time-slice selection happens inside the Pallas pipeline via the prefetched
    # scalar index; the index is clamped so t >= T is a defined read, not OOB.
    f_spec = pl.BlockSpec(
        (pl.Squeezed(), rows, cols),
        lambda i, idx_ref: (jnp.clip(idx_ref[0], 0, T - 1), 0, 0),
    )
    state_spec = pl.BlockSpec((rows, cols), lambda i, idx_ref: (0, 0))
    smem_spec = pl.BlockSpec(memory_space=pltpu.MemorySpace.SMEM)

    grid_spec = pltpu.PrefetchScalarGridSpec(
        num_scalar_prefetch=1,
        grid=(1,),
        in_specs=[smem_spec, state_spec, f_spec],
        out_specs=state_spec,
    )

    return pl.pallas_call(
        _ode_step_kernel,
        out_shape=jax.ShapeDtypeStruct((rows, cols), T_r.dtype),
        grid_spec=grid_spec,
        compiler_params=pltpu.CompilerParams(
            dimension_semantics=("arbitrary",)),
    )(t_idx, a_av, T_r, forcing)


def room_temperature_ode_all(a_av, T_r, forcing, *, tb=None):
    """Fused evaluation of dT/dt for every timestep in one pallas_call.

    Each output slice [t] equals forward(t, T_r); the per-step results are
    independent, so the time axis is streamed in TB-step chunks and marked
    "parallel" (both TensorCores split it on v7x).
    """
    T, rows, cols = forcing.shape
    if tb is None:
        tb = min(T, 32)
        while T % tb:
            tb -= 1
    assert T % tb == 0, "tb must divide the number of timesteps"

    f_spec = pl.BlockSpec((tb, rows, cols), lambda i: (i, 0, 0))
    state_spec = pl.BlockSpec((rows, cols), lambda i: (0, 0))  # resident across grid
    smem_spec = pl.BlockSpec(memory_space=pltpu.MemorySpace.SMEM)
    out_spec = pl.BlockSpec((tb, rows, cols), lambda i: (i, 0, 0))

    grid_spec = pltpu.PrefetchScalarGridSpec(
        num_scalar_prefetch=0,
        grid=(T // tb,),
        in_specs=[smem_spec, state_spec, f_spec],
        out_specs=out_spec,
    )

    return pl.pallas_call(
        _ode_fused_kernel,
        out_shape=jax.ShapeDtypeStruct((T, rows, cols), T_r.dtype),
        grid_spec=grid_spec,
        compiler_params=pltpu.CompilerParams(
            dimension_semantics=("parallel",)),
    )(a_av, T_r, forcing)


if __name__ == "__main__":
    key = jax.random.PRNGKey(0)
    k1, k2, k3, k4, k5 = jax.random.split(key, 5)

    T_STEPS = 64

    # Deterministic synthetic "module parameters" / inputs.
    T_a = 15.0 + 10.0 * jax.random.uniform(k1, (T_STEPS, ROWS, COLS), jnp.float32)
    S_t = jax.random.uniform(k2, (T_STEPS, ROWS, COLS), jnp.float32)
    E_h = jax.random.uniform(k3, (T_STEPS, ROWS, COLS), jnp.float32)
    O = jax.random.uniform(k4, (T_STEPS, ROWS, COLS), jnp.float32)
    T_r = 20.0 + jax.random.normal(k5, (ROWS, COLS), jnp.float32)

    # constants = (a_a, a_s, a_h, a_v, a_o)
    constants = (0.05, 0.01, 0.2, 0.03, 0.1)

    # "Module init"-time preprocessing: fold constants into the forcing term.
    forcing, a_av = init_forcing((T_a, S_t, E_h, O), constants)

    # --- single derivative evaluation (exact forward semantics) -------------
    t = jnp.array([3], dtype=jnp.int32)  # idx = int(t.item())
    dTdt = room_temperature_ode(t, a_av, T_r, forcing)
    dTdt = jax.block_until_ready(dTdt)

    # --- fused evaluation over all timesteps (one pallas_call) --------------
    dTdt_all = room_temperature_ode_all(a_av, T_r, forcing, tb=16)
    dTdt_all = jax.block_until_ready(dTdt_all)

    # Pure-JAX reference check (literal PyTorch expression, unfolded).
    a_a, a_s, a_h, a_v, a_o = constants
    diff = T_a - T_r[None]  # (T, ROWS, COLS)
    ref_all = diff * a_a + S_t * a_s + E_h * a_h + diff * a_v + O * a_o

    idx = int(t[0])
    assert jnp.allclose(dTdt, ref_all[idx], rtol=1e-5, atol=1e-5)
    assert jnp.allclose(dTdt_all, ref_all, rtol=1e-5, atol=1e-5)
    assert jnp.allclose(dTdt, dTdt_all[idx], rtol=1e-6, atol=1e-6)

    print("KERNEL_OK")
</pallas_src>

<mosaic_0001>
module attributes {stable_mosaic.version = 11 : i64} {
  func.func @_ode_step_kernel(%arg0: i32, %arg1: memref<1xi32, #tpu.memory_space<smem>>, %arg2: memref<1xf32, #tpu.memory_space<smem>>, %arg3: memref<8x256xf32, #tpu.memory_space<vmem>>, %arg4: memref<1x8x256xf32, #tpu.memory_space<vmem>>, %arg5: memref<8x256xf32, #tpu.memory_space<vmem>>) attributes {dimension_semantics = [#tpu.dimension_semantics<arbitrary>], iteration_bounds = array<i64: 1>, scalar_prefetch = 1 : i64, scratch_operands = 0 : i64, tpu.core_type = #tpu.core_type<tc>, window_params = [{transform_indices = @transform_0, window_bounds = array<i64: 1>}, {pipeline_mode = #tpu.pipeline_mode<synchronous>, transform_indices = @transform_1, window_bounds = array<i64: 8, 256>}, {transform_indices = @transform_2, window_bounds = array<i64: 1, 8, 256>}, {pipeline_mode = #tpu.pipeline_mode<synchronous>, transform_indices = @transform_3, window_bounds = array<i64: 8, 256>}]} {
    %c0 = arith.constant 0 : index
    %c0_0 = arith.constant 0 : index
    %c0_1 = arith.constant 0 : index
    %0 = vector.load %arg4[%c0, %c0_0, %c0_1] : memref<1x8x256xf32, #tpu.memory_space<vmem>>, vector<1x8x256xf32>
    %1 = vector.shape_cast %0 : vector<1x8x256xf32> to vector<8x256xf32>
    %c0_2 = arith.constant 0 : index
    %2 = memref.load %arg2[%c0_2] : memref<1xf32, #tpu.memory_space<smem>>
    %c0_3 = arith.constant 0 : index
    %c0_4 = arith.constant 0 : index
    %3 = vector.load %arg3[%c0_3, %c0_4] : memref<8x256xf32, #tpu.memory_space<vmem>>, vector<8x256xf32>
    %4 = vector.broadcast %2 : f32 to vector<8x256xf32>
    %5 = arith.mulf %4, %3 : vector<8x256xf32>
    %6 = arith.subf %1, %5 : vector<8x256xf32>
    %c0_5 = arith.constant 0 : index
    %c0_6 = arith.constant 0 : index
    %7 = vector.load %arg5[%c0_5, %c0_6] : memref<8x256xf32, #tpu.memory_space<vmem>>, vector<8x256xf32>
    tpu.vector_store %arg5[%c0_5, %c0_6], %6 {strides = array<i32>} : memref<8x256xf32, #tpu.memory_space<vmem>>, vector<8x256xf32>,
    return
  }
  func.func @transform_0(%arg0: i32, %arg1: memref<1xi32, #tpu.memory_space<smem>>) -> i32 {
    %c0_i32 = arith.constant 0 : i32
    %c0_i32_0 = arith.constant 0 : i32
    return %c0_i32 : i32
  }
  func.func @transform_1(%arg0: i32, %arg1: memref<1xi32, #tpu.memory_space<smem>>) -> (i32, i32) {
    %c0_i32 = arith.constant 0 : i32
    %c0_i32_0 = arith.constant 0 : i32
    %c0_i32_1 = arith.constant 0 : i32
    return %c0_i32, %c0_i32_0 : i32, i32
  }
  func.func @transform_2(%arg0: i32, %arg1: memref<1xi32, #tpu.memory_space<smem>>) -> (i32, i32, i32) {
    %c0 = arith.constant 0 : index
    %0 = memref.load %arg1[%c0] : memref<1xi32, #tpu.memory_space<smem>>
    %c0_i32 = arith.constant 0 : i32
    %c63_i32 = arith.constant 63 : i32
    %1 = arith.maxsi %c0_i32, %0 : i32
    %2 = arith.minsi %c63_i32, %1 : i32
    %c0_i32_0 = arith.constant 0 : i32
    %c0_i32_1 = arith.constant 0 : i32
    %c0_i32_2 = arith.constant 0 : i32
    return %2, %c0_i32_0, %c0_i32_1 : i32, i32, i32
  }
  func.func @transform_3(%arg0: i32, %arg1: memref<1xi32, #tpu.memory_space<smem>>) -> (i32, i32) {
    %c0_i32 = arith.constant 0 : i32
    %c0_i32_0 = arith.constant 0 : i32
    %c0_i32_1 = arith.constant 0 : i32
    return %c0_i32, %c0_i32_0 : i32, i32
  }
}

</mosaic_0001>

<bundles_post_ra>
// kernel: tpu_custom_call.1
= control target key start
LH: loop header
LB: loop body
LE: loop exit
PB: predicated region body
PF: predicated region fallthrough
CT: control target
= control target key end

     0   :  { %11 = vsyncpa [#allocation6], 0  ;;  %s237_s0 = inlined_call_operand.<no memory space> [shape: s32[1], index: 0, kind: input, shape index: {}]   ;;  %s238_s1 = inlined_call_operand.<no memory space> [shape: f32[1], index: 1, kind: input, shape index: {}]   ;;  %s239_s2 = inlined_call_operand.hbm [shape: f32[8,256], index: 2, kind: input, shape index: {}]   ;;  %s240_s3 = inlined_call_operand.hbm [shape: f32[64,8,256], index: 3, kind: input, shape index: {}]   ;;  %s241_s4 = inlined_call_operand.hbm [shape: f32[8,256], index: 4, kind: output, shape index: {}]  }
   0x1   :  { %12 = vsyncpa [#allocation9], 0 }
   0x2   :  { %13 = vsyncpa [#allocation7], 0  ;;  %s21_s17 = sshll.u32 %s239_s2, 4  ;;  %s182_s18 = smov [#allocation5]   ;;  %s22_s17 = int_to_ptr.hbm [resolvable:$true] %s21_s17 }
   0x3   :  { %s23_s19 = sshll.u32 %s182_s18, 4  ;;  %p30_p0 = scmp.gt.s32.totalorder %s237_s0, 0  ;;  %s24_s19 = int_to_ptr.vmem [resolvable:$true] %s23_s19 }
   0x4   :  { %26 = dma.hbm_to_vmem [thread:$0]  %s22_s17, 256, %s24_s19, [#allocation6]  }
   0x5   :  { %s31_s24 = scalar_select %p30_p0, %s237_s0, 0 }
   0x6   :  { %p91_p1 = scmp.lt.s32.totalorder %s237_s0, 63  ;;  %s183_s27 = smov [#allocation8]  }
   0x7   :  { %s42_s28 = sshll.u32 %s183_s27, 4  ;;  %s132_s11 = scalar_lea.hbm %s240_s3, 1024  ;;  %s43_s28 = int_to_ptr.vmem [resolvable:$true] %s42_s28 }
   0x8   :  { %s243_s24 = smov (!%p91_p1, %s31_s24), 63 }
   0x9   :  { %s100_s2 = sshll.u32 %s243_s24, 4 }
   0xa   :  { %s38_s5 = scalar_lea.hbm %s240_s3, %s100_s2 }
   0xb   :  { %s40_s6 = sshll.u32 %s38_s5, 4  ;;  %s41_s6 = int_to_ptr.hbm [resolvable:$true] %s40_s6 }
   0xc   :  { %s128_s7 = sshra.s32 %s41_s6, 4  ;;  %s129_s7 = int_to_ptr.hbm [resolvable:$true] %s128_s7 }
   0xd   :  { %s130_s8 = scalar_lea.hbm %s129_s7, 16  ;;  %p133_p3 = scmp.lt.s32.totalorder %s129_s7, %s240_s3 }
   0xe   :  { %p131_p2 = scmp.ne.s32.totalorder %s129_s7, %s130_s8  ;;  %p134_p4 = scmp.lt.s32.totalorder %s132_s11, %s130_s8 }
  0x10   :  { %p135_p5 = por %p134_p4, %p133_p3 }
  0x12   :  { %p136_p6 = pnand %p135_p5, %p131_p2 }
  0x14   :  { %139 = shalt.err (!%p136_p6)
}
  0x15   :  { %45 = dma.hbm_to_vmem [thread:$0]  %s41_s6, 256, %s43_s28, [#allocation9]  }
  0x16   :  { %176 = dma.done.wait [#allocation6], 256  }
  0x17   :  { %177 = vsyncadd [#allocation6], 4294967040 }
  0x18   :  { %178 = dma.done.wait [#allocation9], 256  }
  0x19   :  { %179 = vsyncadd [#allocation9], 4294967040  ;;  %v64_v0 = vstv %s238_s1  ;;  %v59_v1 = vld [vmem:[#allocation8] sm:$0xff]  ;;  %v62_v2 = vld [vmem:[#allocation5] sm:$0xff]  ;;  %s184_s15 = smov [#allocation10]   ;;  %s78_s18 = sshll.u32 %s241_s4, 4  ;;  %s79_s18 = int_to_ptr.hbm [resolvable:$true] %s78_s18 }
  0x1a   :  { %v65_v3 = vmul.f32 %v64_v0, %v62_v2  ;;  %v60_v4 = vld [vmem:[#allocation8 + $0x8] sm:$0xff]  ;;  %v63_v5 = vld [vmem:[#allocation5 + $0x8] sm:$0xff]  ;;  %s76_s3 = sshll.u32 %s184_s15, 4  ;;  %s77_s3 = int_to_ptr.vmem [resolvable:$true] %s76_s3 }
  0x1b   :  { %v66_v6 = vmul.f32 %v64_v0, %v63_v5 }
  0x1c   :  { %v67_v7 = vsub.f32 %v59_v1, %v65_v3 }
  0x1d   :  { %v68_v8 = vsub.f32 %v60_v4, %v66_v6 }
  0x1e   :  { %69 = vst [vmem:[#allocation10] sm:$0xff] %v67_v7 }
  0x1f   :  { %70 = vst [vmem:[#allocation10 + $0x8] sm:$0xff] %v68_v8 }
  0x20   :  { %81 = dma.vmem_to_hbm [thread:$0]  %s77_s3, 256, %s79_s18, [#allocation7]  }
  0x21   :  { %180 = dma.done.wait [#allocation7], 256  }
  0x22   :  { %181 = vsyncadd [#allocation7], 4294967040 }
  0x23   :  { %86 = vsyncpa [#allocation6], 1 }
  0x24   :  { %87 = vsyncpa [#allocation9], 1 }
  0x25   :  { %88 = vsyncpa [#allocation7], 1 }

</bundles_post_ra>
